<compile_context>
chip_gen: v5e
topology: v5e:2x2
jax: 0.10.0
libtpu: 0.0.40
codegen_flags: <defaults>
</compile_context>

<pallas_src>
import jax
import jax.numpy as jnp
from jax.experimental import pallas as pl
from jax.experimental.pallas import tpu as pltpu

IN_FEATURES = 256
OUT_FEATURES = 256
MAX_TILE_M = 2048   # bf16: 2x(1 MiB x) + 2x(1 MiB out) + 128 KiB weight << 16 MiB
MIN_TILE_M = 16     # bf16 sublane packing (16, 128)


def domain_classifier_kernel(x_ref, w_ref, b_ref, o_ref):
    # x_ref: (tile_m, 256) bf16; w_ref: (256, 256) bf16 in (in, out) layout;
    # b_ref: (1, 256) f32; o_ref: (tile_m, 256) bf16.
    h = jnp.dot(x_ref[...], w_ref[...], preferred_element_type=jnp.float32)
    h = jnp.maximum(h + b_ref[...], 0.0)          # ReLU in f32 on the VPU (v5e-safe)

    # TODO(synk): F.dropout is identity in eval mode; training-mode dropout
    # would need pltpu.prng_seed / prng_random_bits and a keep-mask.

    # LogSoftmax over dim=1 (features), numerically stable, all in f32.
    m = jnp.max(h, axis=1, keepdims=True)
    s = h - m
    lse = jnp.log(jnp.sum(jnp.exp(s), axis=1, keepdims=True))
    o_ref[...] = (s - lse).astype(o_ref.dtype)


def _pick_tile_m(batch):
    """Tile the batch so large B gets ~8+ grid steps (v7x megacore + pipeline
    depth) while keeping tiles large enough to amortize per-step overhead."""
    if batch <= MIN_TILE_M:
        return MIN_TILE_M
    target = pl.cdiv(batch, 8)                      # aim for ~8 steps
    target = ((target + 127) // 128) * 128          # lane/sublane friendly
    target = max(MIN_TILE_M, min(MAX_TILE_M, target))
    full = ((batch + MIN_TILE_M - 1) // MIN_TILE_M) * MIN_TILE_M
    return min(target, full)


def domain_classifier_forward(x, w1, b1):
    """x: (B, 256); w1: (256, 256) PyTorch (out, in) layout; b1: (256,).

    Returns log_softmax(relu(x @ w1.T + b1), axis=1) as bf16 of shape (B, 256).
    Pass x already in bf16 to avoid an extra HBM cast round-trip.
    """
    B = x.shape[0]
    tile_m = _pick_tile_m(B)
    grid = (pl.cdiv(B, tile_m),)

    x_in = x.astype(jnp.bfloat16)
    w_t = jnp.transpose(w1).astype(jnp.bfloat16)    # one-time (in, out) layout
    b_row = b1.astype(jnp.float32).reshape(1, OUT_FEATURES)

    cost = pl.CostEstimate(
        flops=2 * B * IN_FEATURES * OUT_FEATURES,
        transcendentals=B * OUT_FEATURES,           # exp in the softmax
        bytes_accessed=(x_in.size * 2 + w_t.size * 2 + b_row.size * 4
                        + B * OUT_FEATURES * 2),
    )

    return pl.pallas_call(
        domain_classifier_kernel,
        out_shape=jax.ShapeDtypeStruct((B, OUT_FEATURES), jnp.bfloat16),
        grid_spec=pltpu.PrefetchScalarGridSpec(
            num_scalar_prefetch=0,
            grid=grid,
            in_specs=[
                # Batch-tiled activations: software-pipelined across grid steps.
                pl.BlockSpec((tile_m, IN_FEATURES), lambda i: (i, 0)),
                # Weight + bias: constant block index -> stay VMEM-resident.
                pl.BlockSpec((IN_FEATURES, OUT_FEATURES), lambda i: (0, 0)),
                pl.BlockSpec((1, OUT_FEATURES), lambda i: (0, 0)),
            ],
            out_specs=pl.BlockSpec((tile_m, OUT_FEATURES), lambda i: (i, 0)),
        ),
        compiler_params=pltpu.CompilerParams(
            dimension_semantics=("parallel",),      # independent batch tiles
        ),
        cost_estimate=cost,
    )(x_in, w_t, b_row)


def reference_forward(x, w1, b1):
    h = jnp.maximum(x @ w1.T + b1, 0.0)
    return jax.nn.log_softmax(h, axis=1)


if __name__ == "__main__":
    key = jax.random.PRNGKey(0)
    k_x, k_w1, k_b1 = jax.random.split(key, 3)

    B = 8  # small demo batch; latency-bound here (weight DMA + launch dominate)
    bound = 1.0 / jnp.sqrt(jnp.float32(IN_FEATURES))
    x = jax.random.normal(k_x, (B, IN_FEATURES), dtype=jnp.float32)
    w1 = jax.random.uniform(k_w1, (OUT_FEATURES, IN_FEATURES),
                            dtype=jnp.float32, minval=-bound, maxval=bound)
    b1 = jax.random.uniform(k_b1, (OUT_FEATURES,),
                            dtype=jnp.float32, minval=-bound, maxval=bound)

    out = domain_classifier_forward(x, w1, b1)
    out = jax.block_until_ready(out)

    ref = reference_forward(x, w1, b1)
    assert out.shape == (B, OUT_FEATURES)
    # bf16 I/O -> compare against the f32 reference with bf16-level tolerance.
    assert jnp.allclose(out.astype(jnp.float32), ref, atol=3e-2, rtol=2e-2), \
        "mismatch vs reference"

    print("KERNEL_OK")
</pallas_src>

<mosaic_0001>
module attributes {stable_mosaic.version = 11 : i64} {
  func.func @domain_classifier_kernel(%arg0: i32, %arg1: memref<16x256xbf16, #tpu.memory_space<vmem>>, %arg2: memref<256x256xbf16, #tpu.memory_space<vmem>>, %arg3: memref<1x256xf32, #tpu.memory_space<vmem>>, %arg4: memref<16x256xbf16, #tpu.memory_space<vmem>>) attributes {dimension_semantics = [#tpu.dimension_semantics<parallel>], iteration_bounds = array<i64: 1>, scalar_prefetch = 0 : i64, scratch_operands = 0 : i64, tpu.core_type = #tpu.core_type<tc>, window_params = [{transform_indices = @transform_0, window_bounds = array<i64: 16, 256>}, {pipeline_mode = #tpu.pipeline_mode<synchronous>, transform_indices = @transform_1, window_bounds = array<i64: 256, 256>}, {pipeline_mode = #tpu.pipeline_mode<synchronous>, transform_indices = @transform_2, window_bounds = array<i64: 1, 256>}, {transform_indices = @transform_3, window_bounds = array<i64: 16, 256>}]} {
    %c0 = arith.constant 0 : index
    %c0_0 = arith.constant 0 : index
    %0 = vector.load %arg1[%c0, %c0_0] : memref<16x256xbf16, #tpu.memory_space<vmem>>, vector<16x256xbf16>
    %c0_1 = arith.constant 0 : index
    %c0_2 = arith.constant 0 : index
    %1 = vector.load %arg2[%c0_1, %c0_2] : memref<256x256xbf16, #tpu.memory_space<vmem>>, vector<256x256xbf16>
    %cst = arith.constant dense<0.000000e+00> : vector<16x256xf32>
    %2 = tpu.matmul %0, %1, %cst {dimension_numbers = #tpu.dot_dimension_numbers<[1], [0], [0], [1], [0, 0, 1, 1], [], []>} : vector<16x256xbf16>, vector<256x256xbf16>, vector<16x256xf32> -> vector<16x256xf32>
    %c0_3 = arith.constant 0 : index
    %c0_4 = arith.constant 0 : index
    %3 = vector.load %arg3[%c0_3, %c0_4] : memref<1x256xf32, #tpu.memory_space<vmem>>, vector<1x256xf32>
    %4 = vector.broadcast %3 : vector<1x256xf32> to vector<16x256xf32>
    %5 = arith.addf %2, %4 : vector<16x256xf32>
    %cst_5 = arith.constant 0.000000e+00 : f32
    %6 = vector.broadcast %cst_5 : f32 to vector<16x256xf32>
    %7 = arith.maximumf %5, %6 : vector<16x256xf32>
    %cst_6 = arith.constant dense<0xFF800000> : vector<16xf32>
    %8 = vector.multi_reduction <maximumf>, %7, %cst_6 [1] : vector<16x256xf32> to vector<16xf32>
    %9 = vector.shape_cast %8 : vector<16xf32> to vector<16x1xf32>
    %10 = vector.broadcast %9 : vector<16x1xf32> to vector<16x256xf32>
    %11 = arith.subf %7, %10 : vector<16x256xf32>
    %12 = math.exp %11 : vector<16x256xf32>
    %cst_7 = arith.constant dense<0.000000e+00> : vector<16xf32>
    %13 = vector.multi_reduction <add>, %12, %cst_7 [1] : vector<16x256xf32> to vector<16xf32>
    %14 = vector.shape_cast %13 : vector<16xf32> to vector<16x1xf32>
    %15 = math.log %14 : vector<16x1xf32>
    %16 = vector.broadcast %15 : vector<16x1xf32> to vector<16x256xf32>
    %17 = arith.subf %11, %16 : vector<16x256xf32>
    %18 = arith.truncf %17 : vector<16x256xf32> to vector<16x256xbf16>
    %c0_8 = arith.constant 0 : index
    %c0_9 = arith.constant 0 : index
    %19 = vector.load %arg4[%c0_8, %c0_9] : memref<16x256xbf16, #tpu.memory_space<vmem>>, vector<16x256xbf16>
    tpu.vector_store %arg4[%c0_8, %c0_9], %18 {strides = array<i32>} : memref<16x256xbf16, #tpu.memory_space<vmem>>, vector<16x256xbf16>,
    return
  }
  func.func @transform_0(%arg0: i32) -> (i32, i32) {
    %c0_i32 = arith.constant 0 : i32
    %c0_i32_0 = arith.constant 0 : i32
    return %arg0, %c0_i32 : i32, i32
  }
  func.func @transform_1(%arg0: i32) -> (i32, i32) {
    %c0_i32 = arith.constant 0 : i32
    %c0_i32_0 = arith.constant 0 : i32
    %c0_i32_1 = arith.constant 0 : i32
    return %c0_i32, %c0_i32_0 : i32, i32
  }
  func.func @transform_2(%arg0: i32) -> (i32, i32) {
    %c0_i32 = arith.constant 0 : i32
    %c0_i32_0 = arith.constant 0 : i32
    %c0_i32_1 = arith.constant 0 : i32
    return %c0_i32, %c0_i32_0 : i32, i32
  }
  func.func @transform_3(%arg0: i32) -> (i32, i32) {
    %c0_i32 = arith.constant 0 : i32
    %c0_i32_0 = arith.constant 0 : i32
    return %arg0, %c0_i32 : i32, i32
  }
}

</mosaic_0001>

<bundles_post_ra>
// kernel: tpu_custom_call.1
= control target key start
LH: loop header
LB: loop body
LE: loop exit
PB: predicated region body
PF: predicated region fallthrough
CT: control target
= control target key end

     0   :  { %8 = vsyncpa [#allocation3], 0  ;;  %s723_s0 = inlined_call_operand.hbm [shape: bf16[8,256], index: 0, kind: input, shape index: {}]   ;;  %s724_s1 = inlined_call_operand.hbm [shape: bf16[256,256], index: 1, kind: input, shape index: {}]   ;;  %s725_s2 = inlined_call_operand.hbm [shape: f32[1,256], index: 2, kind: input, shape index: {}]   ;;  %s726_s3 = inlined_call_operand.hbm [shape: bf16[8,256], index: 3, kind: output, shape index: {}]  }
   0x1   :  { %9 = vsyncpa [#allocation6], 0 }
   0x2   :  { %10 = vsyncpa [#allocation4], 0 }
   0x3   :  { %14 = vsyncadd [#allocation3], 128  ;;  %s28_s14 = sshll.u32 %s724_s1, 4  ;;  %s676_s15 = smov [#allocation5]   ;;  %s29_s14 = int_to_ptr.hbm [resolvable:$true] %s28_s14 }
   0x4   :  { %s30_s16 = sshll.u32 %s676_s15, 4  ;;  %s15_s19 = sshll.u32 %s723_s0, 4  ;;  %s31_s16 = int_to_ptr.vmem [resolvable:$true] %s30_s16  ;;  %s16_s19 = int_to_ptr.hbm [resolvable:$true] %s15_s19 }
   0x5   :  { %s677_s20 = smov 128   ;;  %s678_s21 = smov 8  }
   0x6   :  { %36 = dma.hbm_to_vmem [thread:$0]  %s29_s14, 4096, %s31_s16, [#allocation6], %s677_s20, %s677_s20, %s678_s21  }
   0x7   :  { %s679_s22 = smov [#allocation2]   ;;  %s42_s1 = sshll.u32 %s725_s2, 4  ;;  %s43_s1 = int_to_ptr.hbm [resolvable:$true] %s42_s1 }
   0x8   :  { %s17_s23 = sshll.u32 %s679_s22, 4  ;;  %s680_s0 = smov [#allocation7]   ;;  %s18_s23 = int_to_ptr.vmem [resolvable:$true] %s17_s23 }
   0x9   :  { %23 = dma.hbm_to_vmem [thread:$0]  %s16_s19, 128, %s18_s23, [#allocation3], %s677_s20, %s677_s20, %s678_s21  }
   0xa   :  { %s44_s26 = sshll.u32 %s680_s0, 4  ;;  %s45_s26 = int_to_ptr.vmem [resolvable:$true] %s44_s26 }
   0xb   :  { %47 = dma.hbm_to_vmem [thread:$0]  %s43_s1, 32, %s45_s26, [#allocation6]  }
   0xc   :  { %670 = dma.done.wait [#allocation3], 256  }
   0xd   :  { %671 = vsyncadd [#allocation3], 4294967040 }
   0xe   :  { %672 = dma.done.wait [#allocation6], 4128  }
   0xf   :  { %673 = vsyncadd [#allocation6], 4294963168  ;;  %v452_v0 = vld [vmem:[#allocation5 + $0x70] sm:$0xf]  ;;  %v539_v1 = vld [vmem:[#allocation5 + $0x74] sm:$0xf0] }
  0x10   :  { %v516_v2 = vld [vmem:[#allocation5 + $0xf0] sm:$0xf]  ;;  %v453_v3 = vor.u32 %v539_v1, %v452_v0  ;;  %v555_v4 = vld [vmem:[#allocation5 + $0xf4] sm:$0xf0]  ;;  %v538_v5 = vld [vmem:[#allocation5 + $0x74] sm:$0xf] }
  0x11   :  { %v454_v6 = vld [vmem:[#allocation5 + $0x78] sm:$0xf0]  ;;  %v517_v7 = vor.u32 %v555_v4, %v516_v2  ;;  %v554_v9 = vld [vmem:[#allocation5 + $0xf4] sm:$0xf]  ;;  %v444_v11 = vld [vmem:[#allocation5 + $0x60] sm:$0xf] }
  0x12   :  { %v457_v8 = vor.u32 %v538_v5, %v454_v6  ;;  %v518_v10 = vld [vmem:[#allocation5 + $0xf8] sm:$0xf0]  ;;  %270 = vmatpush.bf16.msra.mxu0 %v453_v3  ;;  %v537_v13 = vld [vmem:[#allocation5 + $0x64] sm:$0xf0]  ;;  %v508_v14 = vld [vmem:[#allocation5 + $0xe0] sm:$0xf] }
  0x13   :  { %v521_v12 = vor.u32 %v554_v9, %v518_v10  ;;  %v553_v15 = vld [vmem:[#allocation5 + $0xe4] sm:$0xf0]  ;;  %284 = vmatpush.bf16.msra.mxu1 %v517_v7  ;;  %v445_v16 = vor.u32 %v537_v13, %v444_v11  ;;  %v536_v18 = vld [vmem:[#allocation5 + $0x64] sm:$0xf]  ;;  %v446_v19 = vld [vmem:[#allocation5 + $0x68] sm:$0xf0] }
  0x14   :  { %298 = vmatpush.bf16.msra.mxu2 %v457_v8  ;;  %v509_v17 = vor.u32 %v553_v15, %v508_v14  ;;  %v552_v20 = vld [vmem:[#allocation5 + $0xe4] sm:$0xf]  ;;  %v449_v21 = vor.u32 %v536_v18, %v446_v19  ;;  %v510_v22 = vld [vmem:[#allocation5 + $0xe8] sm:$0xf0]  ;;  %v436_v23 = vld [vmem:[#allocation5 + $0x50] sm:$0xf] }
  0x15   :  { %312 = vmatpush.bf16.msra.mxu3 %v521_v12  ;;  %v535_v24 = vld [vmem:[#allocation5 + $0x54] sm:$0xf0]  ;;  %v513_v25 = vor.u32 %v552_v20, %v510_v22  ;;  %v500_v26 = vld [vmem:[#allocation5 + $0xd0] sm:$0xf]  ;;  %v534_v28 = vld [vmem:[#allocation5 + $0x54] sm:$0xf] }
  0x16   :  { %v551_v27 = vld [vmem:[#allocation5 + $0xd4] sm:$0xf0]  ;;  %271 = vmatpush.bf16.msra.mxu0 %v445_v16  ;;  %v437_v29 = vor.u32 %v535_v24, %v436_v23  ;;  %v438_v30 = vld [vmem:[#allocation5 + $0x58] sm:$0xf0]  ;;  %v550_v31 = vld [vmem:[#allocation5 + $0xd4] sm:$0xf] }
  0x17   :  { %v502_v32 = vld [vmem:[#allocation5 + $0xd8] sm:$0xf0]  ;;  %285 = vmatpush.bf16.msra.mxu1 %v509_v17  ;;  %v501_v33 = vor.u32 %v551_v27, %v500_v26  ;;  %v441_v34 = vor.u32 %v534_v28, %v438_v30  ;;  %v428_v35 = vld [vmem:[#allocation5 + $0x40] sm:$0xf]  ;;  %v533_v36 = vld [vmem:[#allocation5 + $0x44] sm:$0xf0] }
  0x18   :  { %299 = vmatpush.bf16.msra.mxu2 %v449_v21  ;;  %v492_v37 = vld [vmem:[#allocation5 + $0xc0] sm:$0xf]  ;;  %v505_v38 = vor.u32 %v550_v31, %v502_v32  ;;  %v549_v39 = vld [vmem:[#allocation5 + $0xc4] sm:$0xf0]  ;;  %v532_v40 = vld [vmem:[#allocation5 + $0x44] sm:$0xf]  ;;  %v429_v44 = vor.u32 %v533_v36, %v428_v35 }
  0x19   :  { %313 = vmatpush.bf16.msra.mxu3 %v513_v25  ;;  %v430_v41 = vld [vmem:[#allocation5 + $0x48] sm:$0xf0]  ;;  %v548_v42 = vld [vmem:[#allocation5 + $0xc4] sm:$0xf]  ;;  %v493_v45 = vor.u32 %v549_v39, %v492_v37  ;;  %v420_v47 = vld [vmem:[#allocation5 + $0x30] sm:$0xf] }
  0x1a   :  { %v494_v43 = vld [vmem:[#allocation5 + $0xc8] sm:$0xf0]  ;;  %272 = vmatpush.bf16.msra.mxu0 %v437_v29  ;;  %v433_v46 = vor.u32 %v532_v40, %v430_v41  ;;  %v531_v48 = vld [vmem:[#allocation5 + $0x34] sm:$0xf0]  ;;  %v484_v49 = vld [vmem:[#allocation5 + $0xb0] sm:$0xf] }
  0x1b   :  { %286 = vmatpush.bf16.msra.mxu1 %v501_v33  ;;  %v497_v50 = vor.u32 %v548_v42, %v494_v43  ;;  %v547_v51 = vld [vmem:[#allocation5 + $0xb4] sm:$0xf0]  ;;  %v530_v52 = vld [vmem:[#allocation5 + $0x34] sm:$0xf]  ;;  %v422_v53 = vld [vmem:[#allocation5 + $0x38] sm:$0xf0]  ;;  %v421_v56 = vor.u32 %v531_v48, %v420_v47 }
  0x1c   :  { %300 = vmatpush.bf16.msra.mxu2 %v441_v34  ;;  %v546_v54 = vld [vmem:[#allocation5 + $0xb4] sm:$0xf]  ;;  %v486_v55 = vld [vmem:[#allocation5 + $0xb8] sm:$0xf0]  ;;  %v485_v57 = vor.u32 %v547_v51, %v484_v49  ;;  %v425_v58 = vor.u32 %v530_v52, %v422_v53  ;;  %v412_v59 = vld [vmem:[#allocation5 + $0x20] sm:$0xf] }
  0x1d   :  { %314 = vmatpush.bf16.msra.mxu3 %v505_v38  ;;  %v529_v60 = vld [vmem:[#allocation5 + $0x24] sm:$0xf0]  ;;  %v476_v61 = vld [vmem:[#allocation5 + $0xa0] sm:$0xf]  ;;  %v489_v62 = vor.u32 %v546_v54, %v486_v55  ;;  %v528_v0 = vld [vmem:[#allocation5 + $0x24] sm:$0xf] }
  0x1e   :  { %273 = vmatpush.bf16.msra.mxu0 %v429_v44  ;;  %v545_v63 = vld [vmem:[#allocation5 + $0xa4] sm:$0xf0]  ;;  %v414_v1 = vld [vmem:[#allocation5 + $0x28] sm:$0xf0]  ;;  %v544_v2 = vld [vmem:[#allocation5 + $0xa4] sm:$0xf]  ;;  %v413_v4 = vor.u32 %v529_v60, %v412_v59 }
  0x1f   :  { %287 = vmatpush.bf16.msra.mxu1 %v493_v45  ;;  %v478_v3 = vld [vmem:[#allocation5 + $0xa8] sm:$0xf0]  ;;  %v477_v5 = vor.u32 %v545_v63, %v476_v61  ;;  %v417_v6 = vor.u32 %v528_v0, %v414_v1  ;;  %v404_v7 = vld [vmem:[#allocation5 + $0x10] sm:$0xf]  ;;  %v527_v8 = vld [vmem:[#allocation5 + $0x14] sm:$0xf0] }
  0x20   :  { %301 = vmatpush.bf16.msra.mxu2 %v433_v46  ;;  %v468_v9 = vld [vmem:[#allocation5 + $0x90] sm:$0xf]  ;;  %v481_v10 = vor.u32 %v544_v2, %v478_v3  ;;  %v543_v11 = vld [vmem:[#allocation5 + $0x94] sm:$0xf0]  ;;  %v526_v12 = vld [vmem:[#allocation5 + $0x14] sm:$0xf]  ;;  %v405_v16 = vor.u32 %v527_v8, %v404_v7 }
  0x21   :  { %315 = vmatpush.bf16.msra.mxu3 %v497_v50  ;;  %v406_v13 = vld [vmem:[#allocation5 + $0x18] sm:$0xf0]  ;;  %v542_v14 = vld [vmem:[#allocation5 + $0x94] sm:$0xf]  ;;  %v469_v17 = vor.u32 %v543_v11, %v468_v9  ;;  %v396_v19 = vld [vmem:[#allocation5] sm:$0xf] }
  0x22   :  { %274 = vmatpush.bf16.msra.mxu0 %v421_v56  ;;  %v470_v15 = vld [vmem:[#allocation5 + $0x98] sm:$0xf0]  ;;  %v409_v18 = vor.u32 %v526_v12, %v406_v13  ;;  %v525_v20 = vld [vmem:[#allocation5 + $0x4] sm:$0xf0]  ;;  %v460_v21 = vld [vmem:[#allocation5 + $0x80] sm:$0xf] }
  0x23   :  { %288 = vmatpush.bf16.msra.mxu1 %v485_v57  ;;  %v473_v22 = vor.u32 %v542_v14, %v470_v15  ;;  %v541_v23 = vld [vmem:[#allocation5 + $0x84] sm:$0xf0]  ;;  %v524_v24 = vld [vmem:[#allocation5 + $0x4] sm:$0xf]  ;;  %v398_v25 = vld [vmem:[#allocation5 + $0x8] sm:$0xf0]  ;;  %v397_v28 = vor.u32 %v525_v20, %v396_v19 }
  0x24   :  { %302 = vmatpush.bf16.msra.mxu2 %v425_v58  ;;  %v540_v26 = vld [vmem:[#allocation5 + $0x84] sm:$0xf]  ;;  %v462_v27 = vld [vmem:[#allocation5 + $0x88] sm:$0xf0]  ;;  %v388_v29 = vld [vmem:[#allocation2] sm:$0xf]  ;;  %v461_v31 = vor.u32 %v541_v23, %v460_v21  ;;  %v401_v32 = vor.u32 %v524_v24, %v398_v25 }
  0x25   :  { %316 = vmatpush.bf16.msra.mxu3 %v489_v62  ;;  %v523_v30 = vld [vmem:[#allocation2 + $0x4] sm:$0xf0]  ;;  %v522_v33 = vld [vmem:[#allocation2 + $0x4] sm:$0xf]  ;;  %v390_v34 = vld [vmem:[#allocation2 + $0x8] sm:$0xf0]  ;;  %v465_v35 = vor.u32 %v540_v26, %v462_v27 }
  0x26   :  { %275 = vmatpush.bf16.msra.mxu0 %v413_v4  ;;  %v389_v36 = vor.u32 %v523_v30, %v388_v29  ;;  %v393_v37 = vor.u32 %v522_v33, %v390_v34  ;;  %v94_v38 = vld [vmem:[#allocation7] sm:$0x3] }
  0x27   :  { %289 = vmatpush.bf16.msra.mxu1 %v477_v5  ;;  %v96_v39 = vperm.slane %v94_v38, 0  ;;  %v97_v42 = vperm.slane %v94_v38, 1 }
  0x28   :  { %303 = vmatpush.bf16.msra.mxu2 %v417_v6 }
  0x29   :  { %317 = vmatpush.bf16.msra.mxu3 %v481_v10 }
  0x2a   :  { %276 = vmatpush.bf16.msra.mxu0 %v405_v16 }
  0x2b   :  { %290 = vmatpush.bf16.msra.mxu1 %v469_v17 }
  0x2c   :  { %304 = vmatpush.bf16.msra.mxu2 %v409_v18 }
  0x2d   :  { %318 = vmatpush.bf16.msra.mxu3 %v473_v22 }
  0x2e   :  { %277 = vmatpush.bf16.msra.mxu0 %v397_v28 }
  0x2f   :  { %291 = vmatpush.bf16.msra.mxu1 %v461_v31 }
  0x30   :  { %305 = vmatpush.bf16.msra.mxu2 %v401_v32 }
  0x31   :  { %319 = vmatpush.bf16.msra.mxu3 %v465_v35  ;;  %278 = vmatmul.bf16.vlgmr.msra.gmra.mxu0 %v389_v36 }
  0x32   :  { %292 = vmatmul.bf16.vlgmr.msra.gmra.mxu1 %v393_v37 }
  0x33   :  { %306 = vmatmul.bf16.vlgmr.msra.gmra.mxu2 %v389_v36 }
  0x34   :  { %320 = vmatmul.bf16.vlgmr.msra.gmra.mxu3 %v393_v37 }
  0xae   :  { %v279_v40 = vpop.f32.mrf.mxu0 }
  0xaf   :  { %v280_v41 = vadd.f32 %v279_v40, %v96_v39  ;;  %v293_v43 = vpop.f32.mrf.mxu1 }
  0xb1   :  { %v294_v44 = vadd.f32 %v293_v43, %v280_v41 }
  0xb3   :  { %v326_v49 = vmax.f32 %v294_v44, 0.0 }
  0xb6   :  { %v307_v45 = vpop.f32.mrf.mxu2  ;;  %v281_v48 = vpop.f32.mrf.mxu0 }
  0xb7   :  { %v308_v46 = vadd.f32 %v307_v45, %v97_v42  ;;  %v321_v47 = vpop.f32.mrf.mxu3  ;;  %v282_v52 = vadd.f32 %v281_v48, %v96_v39  ;;  %v295_v54 = vpop.f32.mrf.mxu1 }
  0xb9   :  { %v322_v50 = vadd.f32 %v321_v47, %v308_v46  ;;  %v296_v56 = vadd.f32 %v295_v54, %v282_v52 }
  0xbb   :  { %v327_v51 = vmax.f32 %v322_v50, 0.0  ;;  %v328_v60 = vmax.f32 %v296_v56, 0.0 }
  0xbd   :  { %v330_v53 = vmax.f32 %v326_v49, %v327_v51 }
  0xbe   :  { %v309_v55 = vpop.f32.mrf.mxu2 }
  0xbf   :  { %v310_v57 = vadd.f32 %v309_v55, %v97_v42  ;;  %331 = vmax.xlane.f32.xlu0 %v330_v53  ;;  %v323_v58 = vpop.f32.mrf.mxu3 }
  0xc1   :  { %v324_v59 = vadd.f32 %v323_v58, %v310_v57 }
  0xc3   :  { %v329_v61 = vmax.f32 %v324_v59, 0.0 }
  0xc5   :  { %v333_v62 = vmax.f32 %v328_v60, %v329_v61 }
  0xc7   :  { %334 = vmax.xlane.f32.xlu0 %v333_v62 }
 0x132   :  { %v332_v63 = vpop.xlane.xlu0 %331 }
 0x133   :  { %v336_v0 = vsub.f32 %v326_v49, %v332_v63  ;;  %v337_v1 = vsub.f32 %v327_v51, %v332_v63 }
 0x135   :  { %v340_v2 = vmul.f32 1.442695, %v336_v0  ;;  %v342_v3 = vmul.f32 1.442695, %v337_v1 }
 0x137   :  { %562 = vpow2.f32 %v340_v2 }
 0x138   :  { %564 = vpow2.f32 %v342_v3 }
 0x13a   :  { %v335_v4 = vpop.xlane.xlu0 %334 }
 0x13b   :  { %v338_v5 = vsub.f32 %v328_v60, %v335_v4  ;;  %v339_v6 = vsub.f32 %v329_v61, %v335_v4 }
 0x13d   :  { %v563_v7 = vpop.eup %562  ;;  %v344_v8 = vmul.f32 1.442695, %v338_v5  ;;  %v346_v9 = vmul.f32 1.442695, %v339_v6 }
 0x13e   :  { %v565_v10 = vpop.eup %564 }
 0x13f   :  { %566 = vpow2.f32 %v344_v8  ;;  %v348_v11 = vadd.f32 %v565_v10, %v563_v7 }
 0x140   :  { %568 = vpow2.f32 %v346_v9 }
 0x141   :  { %349 = vadd.xlane.f32.xlu1 %v348_v11 }
 0x145   :  { %v567_v12 = vpop.eup %566 }
 0x146   :  { %v569_v13 = vpop.eup %568 }
 0x147   :  { %v351_v14 = vadd.f32 %v569_v13, %v567_v12 }
 0x149   :  { %352 = vadd.xlane.f32.xlu1 %v351_v14 }
 0x1b4   :  { %v350_v15 = vpop.xlane.xlu1 %349 }
 0x1b5   :  { %570 = vlog2.f32 %v350_v15 }
 0x1bb   :  { %v571_v16 = vpop.eup %570 }
 0x1bc   :  { %v355_v17 = vmul.f32 0.6931472, %v571_v16  ;;  %v353_v18 = vpop.xlane.xlu1 %352 }
 0x1bd   :  { %572 = vlog2.f32 %v353_v18 }
 0x1be   :  { %v358_v19 = vsub.f32 %v336_v0, %v355_v17  ;;  %v359_v20 = vsub.f32 %v337_v1, %v355_v17 }
 0x1c0   :  { %v362_v21 = vpack.c.bf16 %v359_v20, %v358_v19 }
 0x1c2   :  { %364 = vst [vmem:[#allocation8] sm:$0xff] %v362_v21 }
 0x1c3   :  { %v573_v22 = vpop.eup %572 }
 0x1c4   :  { %v357_v23 = vmul.f32 0.6931472, %v573_v22 }
 0x1c6   :  { %v360_v24 = vsub.f32 %v338_v5, %v357_v23  ;;  %v361_v25 = vsub.f32 %v339_v6, %v357_v23 }
 0x1c8   :  { %v363_v26 = vpack.c.bf16 %v361_v25, %v360_v24 }
 0x1ca   :  { %365 = vst [vmem:[#allocation8 + $0x8] sm:$0xff] %v363_v26 }
 0x1cb   :  { %369 = vsyncadd [#allocation4], 128  ;;  %s372_s28 = sshll.u32 %s726_s3, 4  ;;  %s681_s29 = smov [#allocation8]   ;;  %s373_s28 = int_to_ptr.hbm [resolvable:$true] %s372_s28 }
 0x1cc   :  { %s370_s30 = sshll.u32 %s681_s29, 4  ;;  %s371_s30 = int_to_ptr.vmem [resolvable:$true] %s370_s30 }
 0x1cd   :  { %378 = dma.vmem_to_hbm [thread:$0]  %s371_s30, 128, %s373_s28, [#allocation4], %s677_s20, %s677_s20, %s678_s21  }
 0x1ce   :  { %674 = dma.done.wait [#allocation4], 256  }
 0x1cf   :  { %675 = vsyncadd [#allocation4], 4294967040 }
 0x1d0   :  { %383 = vsyncpa [#allocation3], 1 }
 0x1d1   :  { %384 = vsyncpa [#allocation6], 1 }
 0x1d2   :  { %385 = vsyncpa [#allocation4], 1 }

</bundles_post_ra>
